<compile_context>
chip_gen: v7x
topology: tpu7x:2x2x1
jax: 0.10.0
libtpu: 0.0.40
codegen_flags: <defaults>
</compile_context>

<pallas_src>
import functools
import math

import jax
import jax.numpy as jnp
from jax.experimental import pallas as pl
from jax.experimental.pallas import tpu as pltpu


def _round_up(v, m):
    return -(-v // m) * m


# ---------------------------------------------------------------------------
# Tiled graph-convolution kernel: out = act(adj @ feats @ W + b)
# ---------------------------------------------------------------------------
def _graph_conv_kernel(adj_ref, x_ref, w_ref, b_ref, o_ref, acc_ref, *,
                       activation):
    k = pl.program_id(1)

    @pl.when(k == 0)
    def _():
        acc_ref[...] = jnp.zeros_like(acc_ref)

    # Stream the NxN adjacency contraction; accumulate in f32.
    acc_ref[...] += jnp.dot(adj_ref[...], x_ref[...],
                            preferred_element_type=jnp.float32)

    @pl.when(k == pl.num_programs(1) - 1)
    def _():
        # Small feature transform + epilogue, once per row tile.
        z = jnp.dot(acc_ref[...].astype(w_ref.dtype), w_ref[...],
                    preferred_element_type=jnp.float32) + b_ref[...]
        if activation == "relu":
            z = jnp.maximum(z, 0.0)
        elif activation == "log_softmax":
            m = jnp.max(z, axis=-1, keepdims=True)
            s = z - m
            z = s - jnp.log(jnp.sum(jnp.exp(s), axis=-1, keepdims=True))
        o_ref[...] = z.astype(o_ref.dtype)


def graph_conv(adj, feats, w, b, *, activation, out_dtype, tm, tk):
    """act(adj @ feats @ w + b) with a (row, contraction) grid."""
    n = adj.shape[0]
    fin = feats.shape[1]
    fout = w.shape[1]
    assert n % tm == 0 and n % tk == 0
    assert fin % 128 == 0 and fout % 128 == 0

    flops = 2 * n * n * fin + 2 * n * fin * fout
    transcendentals = (n * fout + n) if activation == "log_softmax" else 0
    bytes_accessed = (adj.size * adj.dtype.itemsize
                      + feats.size * feats.dtype.itemsize
                      + w.size * w.dtype.itemsize
                      + b.size * b.dtype.itemsize
                      + n * fout * jnp.dtype(out_dtype).itemsize)

    return pl.pallas_call(
        functools.partial(_graph_conv_kernel, activation=activation),
        out_shape=jax.ShapeDtypeStruct((n, fout), out_dtype),
        grid_spec=pltpu.PrefetchScalarGridSpec(
            num_scalar_prefetch=0,
            grid=(n // tm, n // tk),
            in_specs=[
                pl.BlockSpec((tm, tk), lambda i, k: (i, k)),     # adj tile
                pl.BlockSpec((tk, fin), lambda i, k: (k, 0)),    # feature rows
                pl.BlockSpec((fin, fout), lambda i, k: (0, 0)),  # W (whole)
                pl.BlockSpec((1, fout), lambda i, k: (0, 0)),    # bias (whole)
            ],
            out_specs=pl.BlockSpec((tm, fout), lambda i, k: (i, 0)),
            scratch_shapes=[pltpu.VMEM((tm, fin), jnp.float32)],
        ),
        compiler_params=pltpu.CompilerParams(
            dimension_semantics=("parallel", "arbitrary")),
        cost_estimate=pl.CostEstimate(flops=flops,
                                      transcendentals=transcendentals,
                                      bytes_accessed=bytes_accessed),
    )(adj, feats, w, b)


# ---------------------------------------------------------------------------
# Full forward: pad to lane-dense shapes, run two tiled graph-conv passes
# ---------------------------------------------------------------------------
def gcn_forward(x, adj, params, dropout_rate, *, compute_dtype=jnp.bfloat16,
                tm=256, tk=256):
    """GCN forward (eval mode).  tm/tk: 256-multiples suit v6e/v7x MXUs;
    use 128-multiples on v5e."""
    del dropout_rate  # TODO(synk): eval mode -> dropout is identity.
    n, nfeat = x.shape
    nhid = params["w1"].shape[1]
    nclass = params["w2"].shape[1]

    fi = _round_up(nfeat, 128)
    fh = _round_up(nhid, 128)
    fc = _round_up(nclass, 128)
    npad = _round_up(n, math.lcm(tm, tk))

    # Zero-pad node and feature dims (exact for the real rows/cols); cast
    # matmul operands to compute dtype (bf16 default), keep biases f32.
    adj_p = jnp.zeros((npad, npad), compute_dtype).at[:n, :n].set(
        adj.astype(compute_dtype))
    x_p = jnp.zeros((npad, fi), compute_dtype).at[:n, :nfeat].set(
        x.astype(compute_dtype))
    w1_p = jnp.zeros((fi, fh), compute_dtype).at[:nfeat, :nhid].set(
        params["w1"].astype(compute_dtype))
    b1_p = jnp.zeros((1, fh), jnp.float32).at[0, :nhid].set(
        params["b1"].astype(jnp.float32))
    w2_p = jnp.zeros((fh, fc), compute_dtype).at[:nhid, :nclass].set(
        params["w2"].astype(compute_dtype))
    # Padded classes get a large negative bias so log_softmax ignores them.
    b2_p = jnp.full((1, fc), -1e9, jnp.float32).at[0, :nclass].set(
        params["b2"].astype(jnp.float32))

    h = graph_conv(adj_p, x_p, w1_p, b1_p, activation="relu",
                   out_dtype=compute_dtype, tm=tm, tk=tk)
    y = graph_conv(adj_p, h, w2_p, b2_p, activation="log_softmax",
                   out_dtype=jnp.float32, tm=tm, tk=tk)
    return y[:n, :nclass]


# ---------------------------------------------------------------------------
# Deterministic parameter / input construction
# ---------------------------------------------------------------------------
def init_params(key, nfeat, nhid, nclass):
    k1, k2, k3, k4 = jax.random.split(key, 4)
    stdv1 = 1.0 / math.sqrt(nhid)
    stdv2 = 1.0 / math.sqrt(nclass)
    return {
        "w1": jax.random.uniform(k1, (nfeat, nhid), jnp.float32, -stdv1, stdv1),
        "b1": jax.random.uniform(k2, (nhid,), jnp.float32, -stdv1, stdv1),
        "w2": jax.random.uniform(k3, (nhid, nclass), jnp.float32, -stdv2, stdv2),
        "b2": jax.random.uniform(k4, (nclass,), jnp.float32, -stdv2, stdv2),
    }


def make_normalized_adj(key, n):
    """Symmetric random graph with self-loops, row-normalized (pygcn style)."""
    a = (jax.random.uniform(key, (n, n)) < 0.2).astype(jnp.float32)
    a = jnp.maximum(a, a.T)
    a = a + jnp.eye(n, dtype=jnp.float32)
    deg = jnp.sum(a, axis=1, keepdims=True)
    return a / deg


def reference_forward(x, adj, params):
    h = jnp.maximum(adj @ (x @ params["w1"]) + params["b1"], 0.0)
    z = adj @ (h @ params["w2"]) + params["b2"]
    return jax.nn.log_softmax(z, axis=1)


if __name__ == "__main__":
    key = jax.random.PRNGKey(0)
    NFEAT, NHID, NCLASS, DROPOUT = 16, 32, 8, 0.5

    for N in (32, 300):  # single-tile and multi-tile (grid 2x2 after padding)
        k_x, k_adj, k_p = jax.random.split(jax.random.fold_in(key, N), 3)
        x = jax.random.normal(k_x, (N, NFEAT), jnp.float32)
        adj = make_normalized_adj(k_adj, N)
        params = init_params(k_p, NFEAT, NHID, NCLASS)

        y_ref = reference_forward(x, adj, params)

        # f32 compute path: strict check (only padding/reassociation rounding).
        out_f32 = gcn_forward(x, adj, params, DROPOUT,
                              compute_dtype=jnp.float32)
        jax.block_until_ready(out_f32)
        assert out_f32.shape == (N, NCLASS)
        assert jnp.allclose(out_f32, y_ref, atol=1e-4, rtol=1e-4), \
            f"f32 mismatch at N={N}"

        # bf16-operand path (f32 accumulation): production setting.
        out_bf16 = gcn_forward(x, adj, params, DROPOUT,
                               compute_dtype=jnp.bfloat16)
        jax.block_until_ready(out_bf16)
        assert out_bf16.shape == (N, NCLASS)
        assert jnp.allclose(out_bf16, y_ref, atol=5e-2, rtol=5e-2), \
            f"bf16 mismatch at N={N}"

    print("KERNEL_OK")
</pallas_src>

<mosaic_0001>
module attributes {stable_mosaic.version = 11 : i64} {
  func.func @_graph_conv_kernel(%arg0: i32, %arg1: i32, %arg2: memref<256x256xf32, #tpu.memory_space<vmem>>, %arg3: memref<256x128xf32, #tpu.memory_space<vmem>>, %arg4: memref<128x128xf32, #tpu.memory_space<vmem>>, %arg5: memref<1x128xf32, #tpu.memory_space<vmem>>, %arg6: memref<256x128xf32, #tpu.memory_space<vmem>>, %arg7: memref<256x128xf32, #tpu.memory_space<vmem>>) attributes {dimension_semantics = [#tpu.dimension_semantics<parallel>, #tpu.dimension_semantics<arbitrary>], iteration_bounds = array<i64: 1, 1>, scalar_prefetch = 0 : i64, scratch_operands = 1 : i64, tpu.core_type = #tpu.core_type<tc>, window_params = [{transform_indices = @transform_0, window_bounds = array<i64: 256, 256>}, {transform_indices = @transform_1, window_bounds = array<i64: 256, 128>}, {pipeline_mode = #tpu.pipeline_mode<synchronous>, transform_indices = @transform_2, window_bounds = array<i64: 128, 128>}, {pipeline_mode = #tpu.pipeline_mode<synchronous>, transform_indices = @transform_3, window_bounds = array<i64: 1, 128>}, {transform_indices = @transform_4, window_bounds = array<i64: 256, 128>}]} {
    %c0_i32 = arith.constant 0 : i32
    %0 = arith.cmpi eq, %arg1, %c0_i32 : i32
    %1 = arith.extui %0 : i1 to i32
    %c0_i32_0 = arith.constant 0 : i32
    %2 = arith.cmpi ne, %1, %c0_i32_0 : i32
    scf.if %2 {
      %cst_10 = arith.constant 0.000000e+00 : f32
      %12 = vector.broadcast %cst_10 : f32 to vector<256x128xf32>
      %c0_11 = arith.constant 0 : index
      %c0_12 = arith.constant 0 : index
      %13 = vector.load %arg7[%c0_11, %c0_12] : memref<256x128xf32, #tpu.memory_space<vmem>>, vector<256x128xf32>
      tpu.vector_store %arg7[%c0_11, %c0_12], %12 {strides = array<i32>} : memref<256x128xf32, #tpu.memory_space<vmem>>, vector<256x128xf32>,
    } else {
    }
    %c0 = arith.constant 0 : index
    %c0_1 = arith.constant 0 : index
    %3 = vector.load %arg7[%c0, %c0_1] : memref<256x128xf32, #tpu.memory_space<vmem>>, vector<256x128xf32>
    %c0_2 = arith.constant 0 : index
    %c0_3 = arith.constant 0 : index
    %4 = vector.load %arg2[%c0_2, %c0_3] : memref<256x256xf32, #tpu.memory_space<vmem>>, vector<256x256xf32>
    %c0_4 = arith.constant 0 : index
    %c0_5 = arith.constant 0 : index
    %5 = vector.load %arg3[%c0_4, %c0_5] : memref<256x128xf32, #tpu.memory_space<vmem>>, vector<256x128xf32>
    %cst = arith.constant dense<0.000000e+00> : vector<256x128xf32>
    %6 = tpu.matmul %4, %5, %cst {dimension_numbers = #tpu.dot_dimension_numbers<[1], [0], [0], [1], [0, 0, 1, 1], [], []>} : vector<256x256xf32>, vector<256x128xf32>, vector<256x128xf32> -> vector<256x128xf32>
    %7 = arith.addf %3, %6 : vector<256x128xf32>
    %c0_6 = arith.constant 0 : index
    %c0_7 = arith.constant 0 : index
    %8 = vector.load %arg7[%c0_6, %c0_7] : memref<256x128xf32, #tpu.memory_space<vmem>>, vector<256x128xf32>
    tpu.vector_store %arg7[%c0_6, %c0_7], %7 {strides = array<i32>} : memref<256x128xf32, #tpu.memory_space<vmem>>, vector<256x128xf32>,
    %c0_i32_8 = arith.constant 0 : i32
    %9 = arith.cmpi eq, %arg1, %c0_i32_8 : i32
    %10 = arith.extui %9 : i1 to i32
    %c0_i32_9 = arith.constant 0 : i32
    %11 = arith.cmpi ne, %10, %c0_i32_9 : i32
    scf.if %11 {
      %c0_10 = arith.constant 0 : index
      %c0_11 = arith.constant 0 : index
      %12 = vector.load %arg7[%c0_10, %c0_11] : memref<256x128xf32, #tpu.memory_space<vmem>>, vector<256x128xf32>
      %c0_12 = arith.constant 0 : index
      %c0_13 = arith.constant 0 : index
      %13 = vector.load %arg4[%c0_12, %c0_13] : memref<128x128xf32, #tpu.memory_space<vmem>>, vector<128x128xf32>
      %cst_14 = arith.constant dense<0.000000e+00> : vector<256x128xf32>
      %14 = tpu.matmul %12, %13, %cst_14 {dimension_numbers = #tpu.dot_dimension_numbers<[1], [0], [0], [1], [0, 0, 1, 1], [], []>} : vector<256x128xf32>, vector<128x128xf32>, vector<256x128xf32> -> vector<256x128xf32>
      %c0_15 = arith.constant 0 : index
      %c0_16 = arith.constant 0 : index
      %15 = vector.load %arg5[%c0_15, %c0_16] : memref<1x128xf32, #tpu.memory_space<vmem>>, vector<1x128xf32>
      %16 = vector.broadcast %15 : vector<1x128xf32> to vector<256x128xf32>
      %17 = arith.addf %14, %16 : vector<256x128xf32>
      %cst_17 = arith.constant 0.000000e+00 : f32
      %18 = vector.broadcast %cst_17 : f32 to vector<256x128xf32>
      %19 = arith.maximumf %17, %18 : vector<256x128xf32>
      %c0_18 = arith.constant 0 : index
      %c0_19 = arith.constant 0 : index
      %20 = vector.load %arg6[%c0_18, %c0_19] : memref<256x128xf32, #tpu.memory_space<vmem>>, vector<256x128xf32>
      tpu.vector_store %arg6[%c0_18, %c0_19], %19 {strides = array<i32>} : memref<256x128xf32, #tpu.memory_space<vmem>>, vector<256x128xf32>,
    } else {
    }
    return
  }
  func.func @transform_0(%arg0: i32, %arg1: i32) -> (i32, i32) {
    %c0_i32 = arith.constant 0 : i32
    return %arg0, %arg1 : i32, i32
  }
  func.func @transform_1(%arg0: i32, %arg1: i32) -> (i32, i32) {
    %c0_i32 = arith.constant 0 : i32
    %c0_i32_0 = arith.constant 0 : i32
    return %arg1, %c0_i32 : i32, i32
  }
  func.func @transform_2(%arg0: i32, %arg1: i32) -> (i32, i32) {
    %c0_i32 = arith.constant 0 : i32
    %c0_i32_0 = arith.constant 0 : i32
    %c0_i32_1 = arith.constant 0 : i32
    return %c0_i32, %c0_i32_0 : i32, i32
  }
  func.func @transform_3(%arg0: i32, %arg1: i32) -> (i32, i32) {
    %c0_i32 = arith.constant 0 : i32
    %c0_i32_0 = arith.constant 0 : i32
    %c0_i32_1 = arith.constant 0 : i32
    return %c0_i32, %c0_i32_0 : i32, i32
  }
  func.func @transform_4(%arg0: i32, %arg1: i32) -> (i32, i32) {
    %c0_i32 = arith.constant 0 : i32
    %c0_i32_0 = arith.constant 0 : i32
    return %arg0, %c0_i32 : i32, i32
  }
}

</mosaic_0001>

<bundles_post_ra>
// kernel: tpu_custom_call.1
= control target key start
LH: loop header
LB: loop body
LE: loop exit
PB: predicated region body
PF: predicated region fallthrough
CT: control target
= control target key end

     0   :  { %9 = vsyncpa [#allocation4], 0  ;;  %s1399_s0 = inlined_call_operand.hbm [shape: f32[256,256], index: 0, kind: input, shape index: {}]   ;;  %s1400_s1 = inlined_call_operand.hbm [shape: f32[256,128], index: 1, kind: input, shape index: {}]   ;;  %s1401_s2 = inlined_call_operand.hbm [shape: f32[128,128], index: 2, kind: input, shape index: {}]   ;;  %s1402_s3 = inlined_call_operand.vmem [shape: f32[1,128], index: 3, kind: input, shape index: {}]   ;;  %s1403_s4 = inlined_call_operand.hbm [shape: f32[256,128], index: 4, kind: output, shape index: {}]  }
   0x1   :  { %10 = vsyncpa [#allocation7], 0 }
   0x2   :  { %11 = vsyncpa [#allocation5], 0  ;;  %s1221_s15 = smov [#allocation6]   ;;  %s1127_s19 = scalar_lea.hbm %s1400_s1, 4096 }
   0x3   :  { %s29_s16 = sshll.u32 %s1221_s15, 4  ;;  %p1128_p0 = scmp.ne.s32.totalorder %s1400_s1, %s1127_s19  ;;  %s30_s16 = int_to_ptr.vmem [resolvable:$true] %s29_s16 }
   0x4   :  { %p1131_p1 = scmp.lt.u32.totalorder %s1127_s19, %s1400_s1 }
   0x6   :  { %p1133_p2 = pnand %p1131_p1, %p1128_p0 }
   0x8   :  { %1136 = shalt.err (!%p1133_p2)
}
   0x9   :  { %s1137_s24 = scalar_lea.vmem %s30_s16, 4096  ;;  %p1142_p4 = scmp.lt.s32.totalorder %s30_s16, %s30_s16 }
   0xa   :  { %p1138_p3 = scmp.ne.s32.totalorder %s30_s16, %s1137_s24  ;;  %p1143_p5 = scmp.lt.s32.totalorder %s1137_s24, %s1137_s24 }
   0xc   :  { %p1144_p6 = por %p1143_p5, %p1142_p4 }
   0xe   :  { %p1145_p7 = pnand %p1144_p6, %p1138_p3 }
  0x10   :  { %1148 = shalt.err (!%p1145_p7)
}
  0x11   :  { %s1222_s25 = smov 128   ;;  %s1223_s26 = smov 8  }
  0x12   :  { %35 = dma.hbm_to_vmem [thread:$0]  %s1400_s1, 4096, %s30_s16, [#allocation7], %s1222_s25, %s1222_s25, %s1223_s26  }
  0x13   :  { %s1224_s29 = smov [#allocation3]   ;;  %s1149_s7 = scalar_lea.hbm %s1399_s0, 8192 }
  0x14   :  { %s17_s30 = sshll.u32 %s1224_s29, 4  ;;  %p1150_p8 = scmp.ne.s32.totalorder %s1399_s0, %s1149_s7  ;;  %s18_s30 = int_to_ptr.vmem [resolvable:$true] %s17_s30 }
  0x15   :  { %p1153_p9 = scmp.lt.u32.totalorder %s1149_s7, %s1399_s0 }
  0x17   :  { %p1155_p10 = pnand %p1153_p9, %p1150_p8 }
  0x19   :  { %1158 = shalt.err (!%p1155_p10)
}
  0x1a   :  { %s1159_s12 = scalar_lea.vmem %s18_s30, 8192  ;;  %p1164_p12 = scmp.lt.s32.totalorder %s18_s30, %s18_s30 }
  0x1b   :  { %p1160_p11 = scmp.ne.s32.totalorder %s18_s30, %s1159_s12  ;;  %p1165_p13 = scmp.lt.s32.totalorder %s1159_s12, %s1159_s12 }
  0x1d   :  { %p1166_p0 = por %p1165_p13, %p1164_p12 }
  0x1f   :  { %p1167_p1 = pnand %p1166_p0, %p1160_p11 }
  0x21   :  { %1170 = shalt.err (!%p1167_p1)
}
  0x22   :  { %s1225_s1 = smov 256   ;;  %s1226_s13 = smov 16  }
  0x23   :  { %23 = dma.hbm_to_vmem [thread:$0]  %s1399_s0, 8192, %s18_s30, [#allocation4], %s1225_s1, %s1225_s1, %s1226_s13  }
  0x24   :  { %s1227_s16 = smov [#allocation8]   ;;  %s1171_s20 = scalar_lea.hbm %s1401_s2, 2048 }
  0x25   :  { %s41_s17 = sshll.u32 %s1227_s16, 4  ;;  %p1172_p2 = scmp.ne.s32.totalorder %s1401_s2, %s1171_s20  ;;  %s42_s17 = int_to_ptr.vmem [resolvable:$true] %s41_s17 }
  0x26   :  { %p1175_p3 = scmp.lt.u32.totalorder %s1171_s20, %s1401_s2 }
  0x28   :  { %p1177_p4 = pnand %p1175_p3, %p1172_p2 }
  0x2a   :  { %1180 = shalt.err (!%p1177_p4)
}
  0x2b   :  { %s1181_s27 = scalar_lea.vmem %s42_s17, 2048  ;;  %p1186_p6 = scmp.lt.s32.totalorder %s42_s17, %s42_s17 }
  0x2c   :  { %p1182_p5 = scmp.ne.s32.totalorder %s42_s17, %s1181_s27  ;;  %p1187_p7 = scmp.lt.s32.totalorder %s1181_s27, %s1181_s27 }
  0x2e   :  { %p1188_p8 = por %p1187_p7, %p1186_p6 }
  0x30   :  { %p1189_p9 = pnand %p1188_p8, %p1182_p5 }
  0x32   :  { %1192 = shalt.err (!%p1189_p9)
}
  0x33   :  { %47 = dma.hbm_to_vmem [thread:$0]  %s1401_s2, 2048, %s42_s17, [#allocation7], %s1222_s25, %s1222_s25, %s1223_s26  }
  0x34   :  { %1215 = dma.done.wait [#allocation4], 8192  }
  0x35   :  { %1216 = vsyncadd [#allocation4], 4294959104 }
  0x36   :  { %1217 = dma.done.wait [#allocation7], 6144  }
  0x37   :  { %1218 = vsyncadd [#allocation7], 4294961152  ;;  %v1228_v0 = vmov 0.0|0.0   ;;  %v191_v1 = vld [vmem:[#allocation6] sm:$0xff]  ;;  %v192_v2 = vld [vmem:[#allocation6 + $0x8] sm:$0xff] }
  0x38   :  { %1006 = vmatprep.subr.bf16.mxu0 %v1228_v0  ;;  %1086 = vmatprep.subr.bf16.mxu1 %v1228_v0  ;;  %v193_v3 = vld [vmem:[#allocation6 + $0x10] sm:$0xff]  ;;  %v1007_v4 = vpack.c.bf16 %v192_v2, %v191_v1  ;;  %v194_v5 = vld [vmem:[#allocation6 + $0x18] sm:$0xff]  ;;  %v195_v7 = vld [vmem:[#allocation6 + $0x20] sm:$0xff] }
  0x39   :  { %v1010_v6 = vpack.c.bf16 %v194_v5, %v193_v3  ;;  %v196_v8 = vld [vmem:[#allocation6 + $0x28] sm:$0xff]  ;;  %v197_v10 = vld [vmem:[#allocation6 + $0x30] sm:$0xff]  ;;  %v198_v11 = vld [vmem:[#allocation6 + $0x38] sm:$0xff] }
  0x3a   :  { %1008 = vmatpush1.bf16.msra.mxu0 %v1007_v4  ;;  %1102 = vmatpush1.bf16.msra.mxu1 %v1007_v4  ;;  %v1013_v9 = vpack.c.bf16 %v196_v8, %v195_v7  ;;  %v128_v12 = vld [vmem:[#allocation3 + $0x8] sm:$0xff]  ;;  %v1016_v13 = vpack.c.bf16 %v198_v11, %v197_v10  ;;  %v199_v14 = vld [vmem:[#allocation6 + $0x40] sm:$0xff]  ;;  %v201_v17 = vld [vmem:[#allocation6 + $0x50] sm:$0xff] }
  0x3b   :  { %1009 = vmatprep.subr.bf16.mxu0 %v1228_v0  ;;  %1087 = vmatprep.subr.bf16.mxu1 %v1228_v0  ;;  %v200_v15 = vld [vmem:[#allocation6 + $0x48] sm:$0xff]  ;;  %v202_v18 = vld [vmem:[#allocation6 + $0x58] sm:$0xff]  ;;  %v203_v20 = vld [vmem:[#allocation6 + $0x60] sm:$0xff] }
  0x3c   :  { %287 = vmatprep.mubr.f32.mxu0 %v128_v12  ;;  %v1019_v16 = vpack.c.bf16 %v200_v15, %v199_v14  ;;  %v1022_v19 = vpack.c.bf16 %v202_v18, %v201_v17  ;;  %v204_v21 = vld [vmem:[#allocation6 + $0x68] sm:$0xff]  ;;  %v205_v23 = vld [vmem:[#allocation6 + $0x70] sm:$0xff]  ;;  %v206_v24 = vld [vmem:[#allocation6 + $0x78] sm:$0xff] }
  0x3d   :  { %v1025_v22 = vpack.c.bf16 %v204_v21, %v203_v20  ;;  %v176_v25 = vld [vmem:[#allocation3 + $0x188] sm:$0xff]  ;;  %v1028_v26 = vpack.c.bf16 %v206_v24, %v205_v23  ;;  %v207_v27 = vld [vmem:[#allocation6 + $0x80] sm:$0xff]  ;;  %v209_v30 = vld [vmem:[#allocation6 + $0x90] sm:$0xff] }
  0x3e   :  { %1011 = vmatpush1.bf16.msra.mxu0 %v1010_v6  ;;  %1103 = vmatpush1.bf16.msra.mxu1 %v1010_v6  ;;  %v208_v28 = vld [vmem:[#allocation6 + $0x88] sm:$0xff]  ;;  %v210_v31 = vld [vmem:[#allocation6 + $0x98] sm:$0xff]  ;;  %v211_v33 = vld [vmem:[#allocation6 + $0xa0] sm:$0xff] }
  0x3f   :  { %1012 = vmatprep.subr.bf16.mxu0 %v1228_v0  ;;  %1088 = vmatprep.subr.bf16.mxu1 %v1228_v0  ;;  %v1031_v29 = vpack.c.bf16 %v208_v28, %v207_v27  ;;  %v1034_v32 = vpack.c.bf16 %v210_v31, %v209_v30  ;;  %v212_v34 = vld [vmem:[#allocation6 + $0xa8] sm:$0xff]  ;;  %v213_v36 = vld [vmem:[#allocation6 + $0xb0] sm:$0xff]  ;;  %v214_v37 = vld [vmem:[#allocation6 + $0xb8] sm:$0xff] }
  0x40   :  { %407 = vmatprep.mubr.f32.mxu1 %v176_v25  ;;  %v1037_v35 = vpack.c.bf16 %v212_v34, %v211_v33  ;;  %v1040_v38 = vpack.c.bf16 %v214_v37, %v213_v36  ;;  %v215_v39 = vld [vmem:[#allocation6 + $0xc0] sm:$0xff]  ;;  %v216_v40 = vld [vmem:[#allocation6 + $0xc8] sm:$0xff]  ;;  %v217_v42 = vld [vmem:[#allocation6 + $0xd0] sm:$0xff] }
  0x41   :  { %v1043_v41 = vpack.c.bf16 %v216_v40, %v215_v39  ;;  %v218_v43 = vld [vmem:[#allocation6 + $0xd8] sm:$0xff]  ;;  %v219_v45 = vld [vmem:[#allocation6 + $0xe0] sm:$0xff]  ;;  %v220_v46 = vld [vmem:[#allocation6 + $0xe8] sm:$0xff] }
  0x42   :  { %1014 = vmatpush1.bf16.msra.mxu0 %v1013_v9  ;;  %1104 = vmatpush1.bf16.msra.mxu1 %v1013_v9  ;;  %v1046_v44 = vpack.c.bf16 %v218_v43, %v217_v42  ;;  %v1049_v47 = vpack.c.bf16 %v220_v46, %v219_v45  ;;  %v221_v48 = vld [vmem:[#allocation6 + $0xf0] sm:$0xff]  ;;  %v222_v49 = vld [vmem:[#allocation6 + $0xf8] sm:$0xff]  ;;  %v547_v50 = vld [vmem:[#allocation8] sm:$0xff] }
  0x43   :  { %1015 = vmatprep.subr.bf16.mxu0 %v1228_v0  ;;  %1089 = vmatprep.subr.bf16.mxu1 %v1228_v0  ;;  %v548_v51 = vld [vmem:[#allocation8 + $0x8] sm:$0xff]  ;;  %v1052_v52 = vpack.c.bf16 %v222_v49, %v221_v48  ;;  %v549_v54 = vld [vmem:[#allocation8 + $0x10] sm:$0xff]  ;;  %v550_v55 = vld [vmem:[#allocation8 + $0x18] sm:$0xff] }
  0x44   :  { %v1054_v53 = vpack.c.bf16 %v548_v51, %v547_v50  ;;  %v127_v56 = vld [vmem:[#allocation3] sm:$0xff]  ;;  %v130_v57 = vld [vmem:[#allocation3 + $0x18] sm:$0xff]  ;;  %v1058_v60 = vpack.c.bf16 %v550_v55, %v549_v54  ;;  %v552_v62 = vld [vmem:[#allocation8 + $0x28] sm:$0xff] }
  0x45   :  { %v175_v58 = vld [vmem:[#allocation3 + $0x180] sm:$0xff]  ;;  %v178_v59 = vld [vmem:[#allocation3 + $0x198] sm:$0xff]  ;;  %v129_v63 = vld [vmem:[#allocation3 + $0x10] sm:$0xff] }
  0x46   :  { %1017 = vmatpush1.bf16.msra.mxu0 %v1016_v13  ;;  %1105 = vmatpush1.bf16.msra.mxu1 %v1016_v13  ;;  %v551_v61 = vld [vmem:[#allocation8 + $0x20] sm:$0xff]  ;;  %v132_v1 = vld [vmem:[#allocation3 + $0x28] sm:$0xff]  ;;  %v553_v4 = vld [vmem:[#allocation8 + $0x30] sm:$0xff] }
  0x47   :  { %1018 = vmatprep.subr.bf16.mxu0 %v1228_v0  ;;  %1090 = vmatprep.subr.bf16.mxu1 %v1228_v0  ;;  %v180_v2 = vld [vmem:[#allocation3 + $0x1a8] sm:$0xff]  ;;  %v1062_v3 = vpack.c.bf16 %v552_v62, %v551_v61  ;;  %v554_v5 = vld [vmem:[#allocation8 + $0x38] sm:$0xff]  ;;  %v131_v6 = vld [vmem:[#allocation3 + $0x20] sm:$0xff] }
  0x48   :  { %v134_v7 = vld [vmem:[#allocation3 + $0x38] sm:$0xff]  ;;  %v179_v8 = vld [vmem:[#allocation3 + $0x1a0] sm:$0xff]  ;;  %v1066_v10 = vpack.c.bf16 %v554_v5, %v553_v4  ;;  %v556_v12 = vld [vmem:[#allocation8 + $0x48] sm:$0xff] }
  0x49   :  { %v182_v9 = vld [vmem:[#allocation3 + $0x1b8] sm:$0xff]  ;;  %v555_v11 = vld [vmem:[#allocation8 + $0x40] sm:$0xff]  ;;  %v133_v13 = vld [vmem:[#allocation3 + $0x30] sm:$0xff] }
  0x4a   :  { %1020 = vmatpush1.bf16.msra.mxu0 %v1019_v16  ;;  %1106 = vmatpush1.bf16.msra.mxu1 %v1019_v16  ;;  %v136_v14 = vld [vmem:[#allocation3 + $0x48] sm:$0xff]  ;;  %v181_v15 = vld [vmem:[#allocation3 + $0x1b0] sm:$0xff]  ;;  %v1070_v17 = vpack.c.bf16 %v556_v12, %v555_v11  ;;  %v135_v20 = vld [vmem:[#allocation3 + $0x40] sm:$0xff] }
  0x4b   :  { %1021 = vmatprep.subr.bf16.mxu0 %v1228_v0  ;;  %1091 = vmatprep.subr.bf16.mxu1 %v1228_v0  ;;  %v184_v16 = vld [vmem:[#allocation3 + $0x1c8] sm:$0xff]  ;;  %v557_v18 = vld [vmem:[#allocation8 + $0x50] sm:$0xff]  ;;  %v138_v21 = vld [vmem:[#allocation3 + $0x58] sm:$0xff] }
  0x4c   :  { %v186_v23 = vld [vmem:[#allocation3 + $0x1d8] sm:$0xff]  ;;  %v559_v25 = vld [vmem:[#allocation8 + $0x60] sm:$0xff]  ;;  %v137_v27 = vld [vmem:[#allocation3 + $0x50] sm:$0xff] }
  0x4d   :  { %v140_v28 = vld [vmem:[#allocation3 + $0x68] sm:$0xff]  ;;  %v142_v33 = vld [vmem:[#allocation3 + $0x78] sm:$0xff]  ;;  %v187_v34 = vld [vmem:[#allocation3 + $0x1e0] sm:$0xff] }
  0x4e   :  { %1023 = vmatpush1.bf16.msra.mxu0 %v1022_v19  ;;  %1107 = vmatpush1.bf16.msra.mxu1 %v1022_v19  ;;  %v558_v19 = vld [vmem:[#allocation8 + $0x58] sm:$0xff]  ;;  %v188_v30 = vld [vmem:[#allocation3 + $0x1e8] sm:$0xff]  ;;  %v141_v36 = vld [vmem:[#allocation3 + $0x70] sm:$0xff] }
  0x4f   :  { %1024 = vmatprep.subr.bf16.mxu0 %v1228_v0  ;;  %1092 = vmatprep.subr.bf16.mxu1 %v1228_v0  ;;  %v1074_v24 = vpack.c.bf16 %v558_v19, %v557_v18  ;;  %v144_v37 = vld [vmem:[#allocation3 + $0x88] sm:$0xff]  ;;  %v143_v39 = vld [vmem:[#allocation3 + $0x80] sm:$0xff]  ;;  %v146_v40 = vld [vmem:[#allocation3 + $0x98] sm:$0xff] }
  0x50   :  { %v148_v42 = vld [vmem:[#allocation3 + $0xa8] sm:$0xff]  ;;  %v147_v43 = vld [vmem:[#allocation3 + $0xa0] sm:$0xff]  ;;  %v149_v45 = vld [vmem:[#allocation3 + $0xb0] sm:$0xff] }
  0x51   :  { %v152_v46 = vld [vmem:[#allocation3 + $0xc8] sm:$0xff]  ;;  %v154_v48 = vld [vmem:[#allocation3 + $0xd8] sm:$0xff]  ;;  %v153_v49 = vld [vmem:[#allocation3 + $0xd0] sm:$0xff] }
  0x52   :  { %1026 = vmatpush1.bf16.msra.mxu0 %v1025_v22  ;;  %1108 = vmatpush1.bf16.msra.mxu1 %v1025_v22  ;;  %v183_v22 = vld [vmem:[#allocation3 + $0x1c0] sm:$0xff]  ;;  %v156_v50 = vld [vmem:[#allocation3 + $0xe8] sm:$0xff]  ;;  %v165_v61 = vld [vmem:[#allocation3 + $0x130] sm:$0xff] }
  0x53   :  { %1027 = vmatprep.subr.bf16.mxu0 %v1228_v0  ;;  %1093 = vmatprep.subr.bf16.mxu1 %v1228_v0  ;;  %v155_v51 = vld [vmem:[#allocation3 + $0xe0] sm:$0xff]  ;;  %v160_v54 = vld [vmem:[#allocation3 + $0x108] sm:$0xff] }
  0x54   :  { %v159_v55 = vld [vmem:[#allocation3 + $0x100] sm:$0xff]  ;;  %v168_v62 = vld [vmem:[#allocation3 + $0x148] sm:$0xff] }
  0x55   :  { %v172_v4 = vld [vmem:[#allocation3 + $0x168] sm:$0xff] }
  0x56   :  { %1029 = vmatpush1.bf16.msra.mxu0 %v1028_v26  ;;  %1109 = vmatpush1.bf16.msra.mxu1 %v1028_v26  ;;  %v560_v26 = vld [vmem:[#allocation8 + $0x68] sm:$0xff] }
  0x57   :  { %1030 = vmatprep.subr.bf16.mxu0 %v1228_v0  ;;  %1094 = vmatprep.subr.bf16.mxu1 %v1228_v0  ;;  %v1078_v31 = vpack.c.bf16 %v560_v26, %v559_v25 }
  0x5a   :  { %1032 = vmatpush1.bf16.msra.mxu0 %v1031_v29  ;;  %1110 = vmatpush1.bf16.msra.mxu1 %v1031_v29  ;;  %v185_v29 = vld [vmem:[#allocation3 + $0x1d0] sm:$0xff] }
  0x5b   :  { %1033 = vmatprep.subr.bf16.mxu0 %v1228_v0  ;;  %1095 = vmatprep.subr.bf16.mxu1 %v1228_v0 }
  0x5e   :  { %1035 = vmatpush1.bf16.msra.mxu0 %v1034_v32  ;;  %1111 = vmatpush1.bf16.msra.mxu1 %v1034_v32  ;;  %v139_v32 = vld [vmem:[#allocation3 + $0x60] sm:$0xff] }
  0x5f   :  { %1036 = vmatprep.subr.bf16.mxu0 %v1228_v0  ;;  %1096 = vmatprep.subr.bf16.mxu1 %v1228_v0 }
  0x62   :  { %1038 = vmatpush1.bf16.msra.mxu0 %v1037_v35  ;;  %1112 = vmatpush1.bf16.msra.mxu1 %v1037_v35  ;;  %v190_v35 = vld [vmem:[#allocation3 + $0x1f8] sm:$0xff] }
  0x63   :  { %1039 = vmatprep.subr.bf16.mxu0 %v1228_v0  ;;  %1097 = vmatprep.subr.bf16.mxu1 %v1228_v0 }
  0x66   :  { %1041 = vmatpush1.bf16.msra.mxu0 %v1040_v38  ;;  %1113 = vmatpush1.bf16.msra.mxu1 %v1040_v38  ;;  %v189_v38 = vld [vmem:[#allocation3 + $0x1f0] sm:$0xff] }
  0x67   :  { %1042 = vmatprep.subr.bf16.mxu0 %v1228_v0  ;;  %1098 = vmatprep.subr.bf16.mxu1 %v1228_v0 }
  0x6a   :  { %1044 = vmatpush1.bf16.msra.mxu0 %v1043_v41  ;;  %1114 = vmatpush1.bf16.msra.mxu1 %v1043_v41  ;;  %v145_v41 = vld [vmem:[#allocation3 + $0x90] sm:$0xff] }
  0x6b   :  { %1045 = vmatprep.subr.bf16.mxu0 %v1228_v0  ;;  %1099 = vmatprep.subr.bf16.mxu1 %v1228_v0 }
  0x6e   :  { %1047 = vmatpush1.bf16.msra.mxu0 %v1046_v44  ;;  %1115 = vmatpush1.bf16.msra.mxu1 %v1046_v44  ;;  %v150_v44 = vld [vmem:[#allocation3 + $0xb8] sm:$0xff] }
  0x6f   :  { %1048 = vmatprep.subr.bf16.mxu0 %v1228_v0  ;;  %1100 = vmatprep.subr.bf16.mxu1 %v1228_v0 }
  0x72   :  { %1050 = vmatpush1.bf16.msra.mxu0 %v1049_v47  ;;  %1116 = vmatpush1.bf16.msra.mxu1 %v1049_v47  ;;  %v151_v47 = vld [vmem:[#allocation3 + $0xc0] sm:$0xff] }
  0x73   :  { %1051 = vmatprep.subr.bf16.mxu0 %v1228_v0  ;;  %1101 = vmatprep.subr.bf16.mxu1 %v1228_v0  ;;  %v177_v0 = vld [vmem:[#allocation3 + $0x190] sm:$0xff] }
  0x76   :  { %1053 = vmatpush1.bf16.msra.mxu0 %v1052_v52  ;;  %1117 = vmatpush1.bf16.msra.mxu1 %v1052_v52  ;;  %v158_v52 = vld [vmem:[#allocation3 + $0xf8] sm:$0xff] }
  0x77   :  { %1055 = vmatprep.subr.bf16.mxu1 %v1054_v53 }
  0x79   :  { %288 = vmatmul.mubr.f32.vlgmr.msra.gmra.mrb[0].mxu0 %v127_v56  ;;  %408 = vmatmul.mubr.f32.vlgmr.msra.gmra.mrb[0].mxu1 %v175_v58  ;;  %v162_v56 = vld [vmem:[#allocation3 + $0x118] sm:$0xff]  ;;  %v164_v58 = vld [vmem:[#allocation3 + $0x128] sm:$0xff] }
  0x7a   :  { %292 = vmatprep.mubr.f32.mxu0 %v130_v57  ;;  %412 = vmatprep.mubr.f32.mxu1 %v178_v59  ;;  %v161_v57 = vld [vmem:[#allocation3 + $0x110] sm:$0xff]  ;;  %v163_v59 = vld [vmem:[#allocation3 + $0x120] sm:$0xff] }
  0x7b   :  { %1057 = vmatpush3.bf16.msra.mxu1 %v1054_v53  ;;  %v157_v53 = vld [vmem:[#allocation3 + $0xf0] sm:$0xff] }
  0x7c   :  { %1059 = vmatprep.subr.bf16.mxu1 %v1058_v60 }
  0x7d   :  { %293 = vmatmul.mubr.f32.gmra.mrb[2].mxu0 %v129_v63  ;;  %413 = vmatmul.mubr.f32.gmra.mrb[2].mxu1 %v177_v0  ;;  %v167_v63 = vld [vmem:[#allocation3 + $0x140] sm:$0xff]  ;;  %v169_v0 = vld [vmem:[#allocation3 + $0x150] sm:$0xff] }
  0x7e   :  { %297 = vmatprep.mubr.f32.mxu0 %v132_v1  ;;  %417 = vmatprep.mubr.f32.mxu1 %v180_v2  ;;  %v170_v1 = vld [vmem:[#allocation3 + $0x158] sm:$0xff]  ;;  %v561_v2 = vld [vmem:[#allocation8 + $0x70] sm:$0xff] }
  0x7f   :  { %1061 = vmatpush3.bf16.msra.mxu1 %v1058_v60  ;;  %v166_v60 = vld [vmem:[#allocation3 + $0x138] sm:$0xff] }
  0x80   :  { %1063 = vmatprep.subr.bf16.mxu1 %v1062_v3 }
  0x81   :  { %298 = vmatmul.mubr.f32.gmra.mrb[4].mxu0 %v131_v6  ;;  %418 = vmatmul.mubr.f32.gmra.mrb[4].mxu1 %v179_v8  ;;  %v171_v6 = vld [vmem:[#allocation3 + $0x160] sm:$0xff]  ;;  %v173_v8 = vld [vmem:[#allocation3 + $0x170] sm:$0xff] }
  0x82   :  { %302 = vmatprep.mubr.f32.mxu0 %v134_v7  ;;  %422 = vmatprep.mubr.f32.mxu1 %v182_v9  ;;  %v174_v7 = vld [vmem:[#allocation3 + $0x178] sm:$0xff] }
  0x83   :  { %1065 = vmatpush3.bf16.msra.mxu1 %v1062_v3  ;;  %v562_v3 = vld [vmem:[#allocation8 + $0x78] sm:$0xff] }
  0x84   :  { %1067 = vmatprep.subr.bf16.mxu1 %v1066_v10  ;;  %v1082_v5 = vpack.c.bf16 %v562_v3, %v561_v2 }
  0x85   :  { %303 = vmatmul.mubr.f32.gmra.mrb[6].mxu0 %v133_v13  ;;  %423 = vmatmul.mubr.f32.gmra.mrb[6].mxu1 %v181_v15 }
  0x86   :  { %307 = vmatprep.mubr.f32.mxu0 %v136_v14  ;;  %427 = vmatprep.mubr.f32.mxu1 %v184_v16 }
  0x87   :  { %1069 = vmatpush3.bf16.msra.mxu1 %v1066_v10 }
  0x88   :  { %1071 = vmatprep.subr.bf16.mxu1 %v1070_v17 }
  0x89   :  { %308 = vmatmul.mubr.f32.gmra.mrb[8].mxu0 %v135_v20  ;;  %428 = vmatmul.mubr.f32.gmra.mrb[8].mxu1 %v183_v22 }
  0x8a   :  { %312 = vmatprep.mubr.f32.mxu0 %v138_v21  ;;  %432 = vmatprep.mubr.f32.mxu1 %v186_v23 }
  0x8b   :  { %1073 = vmatpush3.bf16.msra.mxu1 %v1070_v17 }
  0x8c   :  { %1075 = vmatprep.subr.bf16.mxu1 %v1074_v24 }
  0x8d   :  { %313 = vmatmul.mubr.f32.gmra.mrb[10].mxu0 %v137_v27  ;;  %433 = vmatmul.mubr.f32.gmra.mrb[10].mxu1 %v185_v29 }
  0x8e   :  { %317 = vmatprep.mubr.f32.mxu0 %v140_v28  ;;  %437 = vmatprep.mubr.f32.mxu1 %v188_v30 }
  0x8f   :  { %1077 = vmatpush3.bf16.msra.mxu1 %v1074_v24 }
  0x90   :  { %1079 = vmatprep.subr.bf16.mxu1 %v1078_v31 }
  0x91   :  { %318 = vmatmul.mubr.f32.gmra.mrb[12].mxu0 %v139_v32  ;;  %438 = vmatmul.mubr.f32.gmra.mrb[12].mxu1 %v187_v34 }
  0x92   :  { %322 = vmatprep.mubr.f32.mxu0 %v142_v33  ;;  %442 = vmatprep.mubr.f32.mxu1 %v190_v35 }
  0x93   :  { %1081 = vmatpush3.bf16.msra.mxu1 %v1078_v31 }
  0x94   :  { %1083 = vmatprep.subr.bf16.mxu1 %v1082_v5 }
  0x95   :  { %323 = vmatmul.mubr.f32.gmra.mrb[14].mxu0 %v141_v36  ;;  %443 = vmatmul.mubr.f32.gmra.mrb[14].mxu1 %v189_v38 }
  0x96   :  { %327 = vmatprep.mubr.f32.mxu0 %v144_v37 }
  0x97   :  { %1085 = vmatpush3.bf16.msra.mxu1 %v1082_v5 }
  0x99   :  { %328 = vmatmul.mubr.f32.gmra.mrb[16].mxu0 %v143_v39 }
  0x9a   :  { %332 = vmatprep.mubr.f32.mxu0 %v146_v40 }
  0x9d   :  { %333 = vmatmul.mubr.f32.gmra.mrb[18].mxu0 %v145_v41 }
  0x9e   :  { %337 = vmatprep.mubr.f32.mxu0 %v148_v42 }
  0xa1   :  { %338 = vmatmul.mubr.f32.gmra.mrb[20].mxu0 %v147_v43 }
  0xa2   :  { %342 = vmatprep.mubr.f32.mxu0 %v150_v44 }
  0xa5   :  { %343 = vmatmul.mubr.f32.gmra.mrb[22].mxu0 %v149_v45 }
  0xa6   :  { %347 = vmatprep.mubr.f32.mxu0 %v152_v46 }
  0xa9   :  { %348 = vmatmul.mubr.f32.gmra.mrb[24].mxu0 %v151_v47 }
  0xaa   :  { %352 = vmatprep.mubr.f32.mxu0 %v154_v48 }
  0xad   :  { %353 = vmatmul.mubr.f32.gmra.mrb[26].mxu0 %v153_v49 }
  0xae   :  { %357 = vmatprep.mubr.f32.mxu0 %v156_v50 }
  0xb1   :  { %358 = vmatmul.mubr.f32.gmra.mrb[28].mxu0 %v155_v51 }
  0xb2   :  { %362 = vmatprep.mubr.f32.mxu0 %v158_v52 }
  0xb5   :  { %363 = vmatmul.mubr.f32.gmra.mrb[30].mxu0 %v157_v53 }
  0xb6   :  { %367 = vmatprep.mubr.f32.mxu0 %v160_v54 }
  0xb9   :  { %368 = vmatmul.mubr.f32.gmra.mrb[32].mxu0 %v159_v55 }
  0xba   :  { %372 = vmatprep.mubr.f32.mxu0 %v162_v56 }
  0xbd   :  { %373 = vmatmul.mubr.f32.gmra.mrb[34].mxu0 %v161_v57 }
  0xbe   :  { %377 = vmatprep.mubr.f32.mxu0 %v164_v58 }
  0xc1   :  { %378 = vmatmul.mubr.f32.gmra.mrb[36].mxu0 %v163_v59 }
  0xc2   :  { %382 = vmatprep.mubr.f32.mxu0 %v166_v60 }
  0xc5   :  { %383 = vmatmul.mubr.f32.gmra.mrb[38].mxu0 %v165_v61 }
  0xc6   :  { %387 = vmatprep.mubr.f32.mxu0 %v168_v62 }
  0xc9   :  { %388 = vmatmul.mubr.f32.gmra.mrb[40].mxu0 %v167_v63 }
  0xca   :  { %392 = vmatprep.mubr.f32.mxu0 %v170_v1 }
  0xcd   :  { %393 = vmatmul.mubr.f32.gmra.mrb[42].mxu0 %v169_v0 }
  0xce   :  { %397 = vmatprep.mubr.f32.mxu0 %v172_v4 }
  0xd1   :  { %398 = vmatmul.mubr.f32.gmra.mrb[44].mxu0 %v171_v6 }
  0xd2   :  { %402 = vmatprep.mubr.f32.mxu0 %v174_v7 }
  0xd5   :  { %403 = vmatmul.mubr.f32.gmra.mrb[46].mxu0 %v173_v8 }
 0x14c   :  { %v289_v9 = vpop.f32.mrb[0].mxu0  ;;  %v1329_v11 = vpop.f32.mrb[0].mxu1 }
 0x14d   :  { %v291_v10 = vpop.f32.mrb[1].mxu0  ;;  %958 = vmatprep.mubr.f32.mxu1 %v289_v9  ;;  %v411_v12 = vpop.f32.mrb[1].mxu1  ;;  %v1350_v9 = vld [vmem:[%s1402_s3] ss:$0 sm:$0xff]  ;;  %s1229_s3 = smov [#allocation9]  }
 0x14e   :  { %s864_s30 = sshll.u32 %s1229_s3, 4  ;;  %s865_s30 = int_to_ptr.vmem [resolvable:$true] %s864_s30 }
 0x14f   :  { %s1193_s5 = scalar_lea.vmem %s865_s30, 4096  ;;  %p1198_p11 = scmp.lt.s32.totalorder %s865_s30, %s865_s30 }
 0x150   :  { %v294_v13 = vpop.f32.mrb[2].mxu0  ;;  %v1331_v15 = vpop.f32.mrb[2].mxu1  ;;  %p1194_p10 = scmp.ne.s32.totalorder %s865_s30, %s1193_s5  ;;  %p1199_p12 = scmp.lt.s32.totalorder %s1193_s5, %s1193_s5 }
 0x151   :  { %v296_v14 = vpop.f32.mrb[3].mxu0  ;;  %959 = vmatmul.mubr.f32.vlgmr.msra.gmra.mrb[16].mxu1 %v294_v13  ;;  %v416_v16 = vpop.f32.mrb[3].mxu1 }
 0x152   :  { %p1200_p13 = por %p1199_p12, %p1198_p11 }
 0x154   :  { %v299_v17 = vpop.f32.mrb[4].mxu0  ;;  %v1333_v19 = vpop.f32.mrb[4].mxu1  ;;  %p1201_p0 = pnand %p1200_p13, %p1194_p10 }
 0x155   :  { %v301_v18 = vpop.f32.mrb[5].mxu0  ;;  %961 = vmatprep.mubr.f32.mxu1 %v299_v17  ;;  %v421_v20 = vpop.f32.mrb[5].mxu1 }
 0x158   :  { %v304_v21 = vpop.f32.mrb[6].mxu0  ;;  %v1335_v23 = vpop.f32.mrb[6].mxu1 }
 0x159   :  { %v306_v22 = vpop.f32.mrb[7].mxu0  ;;  %962 = vmatmul.mubr.f32.gmra.mrb[18].mxu1 %v304_v21  ;;  %v426_v24 = vpop.f32.mrb[7].mxu1 }
 0x15c   :  { %v309_v25 = vpop.f32.mrb[8].mxu0  ;;  %v1337_v27 = vpop.f32.mrb[8].mxu1 }
 0x15d   :  { %v311_v26 = vpop.f32.mrb[9].mxu0  ;;  %964 = vmatprep.mubr.f32.mxu1 %v309_v25  ;;  %v431_v28 = vpop.f32.mrb[9].mxu1 }
 0x160   :  { %v314_v29 = vpop.f32.mrb[10].mxu0  ;;  %v1339_v31 = vpop.f32.mrb[10].mxu1 }
 0x161   :  { %v316_v30 = vpop.f32.mrb[11].mxu0  ;;  %965 = vmatmul.mubr.f32.gmra.mrb[20].mxu1 %v314_v29  ;;  %v436_v32 = vpop.f32.mrb[11].mxu1 }
 0x164   :  { %v319_v33 = vpop.f32.mrb[12].mxu0  ;;  %v439_v35 = vpop.f32.mrb[12].mxu1 }
 0x165   :  { %v321_v34 = vpop.f32.mrb[13].mxu0  ;;  %967 = vmatprep.mubr.f32.mxu1 %v319_v33  ;;  %v441_v36 = vpop.f32.mrb[13].mxu1 }
 0x168   :  { %v324_v37 = vpop.f32.mrb[14].mxu0  ;;  %v444_v39 = vpop.f32.mrb[14].mxu1 }
 0x169   :  { %v326_v38 = vpop.f32.mrb[15].mxu0  ;;  %968 = vmatmul.mubr.f32.gmra.mrb[22].mxu1 %v324_v37  ;;  %v446_v40 = vpop.f32.mrb[15].mxu1 }
 0x16c   :  { %v329_v41 = vpop.f32.mrb[16].mxu0 }
 0x16d   :  { %v331_v42 = vpop.f32.mrb[17].mxu0  ;;  %970 = vmatprep.mubr.f32.mxu1 %v329_v41 }
 0x170   :  { %v334_v43 = vpop.f32.mrb[18].mxu0 }
 0x171   :  { %v336_v44 = vpop.f32.mrb[19].mxu0  ;;  %971 = vmatmul.mubr.f32.gmra.mrb[24].mxu1 %v334_v43 }
 0x174   :  { %v339_v45 = vpop.f32.mrb[20].mxu0 }
 0x175   :  { %v341_v46 = vpop.f32.mrb[21].mxu0  ;;  %973 = vmatprep.mubr.f32.mxu1 %v339_v45 }
 0x178   :  { %v344_v47 = vpop.f32.mrb[22].mxu0 }
 0x179   :  { %v346_v48 = vpop.f32.mrb[23].mxu0  ;;  %974 = vmatmul.mubr.f32.gmra.mrb[26].mxu1 %v344_v47 }
 0x17c   :  { %v349_v49 = vpop.f32.mrb[24].mxu0 }
 0x17d   :  { %v351_v50 = vpop.f32.mrb[25].mxu0  ;;  %976 = vmatprep.mubr.f32.mxu1 %v349_v49 }
 0x180   :  { %v354_v51 = vpop.f32.mrb[26].mxu0 }
 0x181   :  { %v356_v52 = vpop.f32.mrb[27].mxu0  ;;  %977 = vmatmul.mubr.f32.gmra.mrb[28].mxu1 %v354_v51 }
 0x184   :  { %v359_v53 = vpop.f32.mrb[28].mxu0 }
 0x185   :  { %v361_v54 = vpop.f32.mrb[29].mxu0  ;;  %979 = vmatprep.mubr.f32.mxu1 %v359_v53 }
 0x188   :  { %v364_v55 = vpop.f32.mrb[30].mxu0 }
 0x189   :  { %v366_v56 = vpop.f32.mrb[31].mxu0  ;;  %980 = vmatmul.mubr.f32.gmra.mrb[30].mxu1 %v364_v55 }
 0x18c   :  { %v369_v57 = vpop.f32.mrb[32].mxu0 }
 0x18d   :  { %v371_v58 = vpop.f32.mrb[33].mxu0  ;;  %982 = vmatprep.mubr.f32.mxu1 %v369_v57 }
 0x190   :  { %v374_v59 = vpop.f32.mrb[34].mxu0 }
 0x191   :  { %v376_v60 = vpop.f32.mrb[35].mxu0  ;;  %983 = vmatmul.mubr.f32.gmra.mrb[32].mxu1 %v374_v59 }
 0x194   :  { %v379_v61 = vpop.f32.mrb[36].mxu0 }
 0x195   :  { %v381_v62 = vpop.f32.mrb[37].mxu0  ;;  %985 = vmatprep.mubr.f32.mxu1 %v379_v61 }
 0x198   :  { %v384_v63 = vpop.f32.mrb[38].mxu0 }
 0x199   :  { %v386_v1 = vpop.f32.mrb[39].mxu0  ;;  %986 = vmatmul.mubr.f32.gmra.mrb[34].mxu1 %v384_v63 }
 0x19c   :  { %v389_v0 = vpop.f32.mrb[40].mxu0 }
 0x19d   :  { %v391_v2 = vpop.f32.mrb[41].mxu0  ;;  %988 = vmatprep.mubr.f32.mxu1 %v389_v0 }
 0x1a0   :  { %v394_v3 = vpop.f32.mrb[42].mxu0 }
 0x1a1   :  { %v396_v4 = vpop.f32.mrb[43].mxu0  ;;  %989 = vmatmul.mubr.f32.gmra.mrb[36].mxu1 %v394_v3 }
 0x1a4   :  { %v399_v5 = vpop.f32.mrb[44].mxu0 }
 0x1a5   :  { %v401_v6 = vpop.f32.mrb[45].mxu0  ;;  %991 = vmatprep.mubr.f32.mxu1 %v399_v5 }
 0x1a8   :  { %v404_v7 = vpop.f32.mrb[46].mxu0 }
 0x1a9   :  { %v406_v8 = vpop.f32.mrb[47].mxu0  ;;  %992 = vmatmul.mubr.f32.gmra.mrb[38].mxu1 %v404_v7 }
 0x1aa   :  { %994 = vmatprep.mubr.f32.mxu1 %v1329_v11 }
 0x1ad   :  { %995 = vmatmul.mubr.f32.gmra.mrb[40].mxu1 %v1331_v15 }
 0x1ae   :  { %997 = vmatprep.mubr.f32.mxu1 %v1333_v19 }
 0x1b1   :  { %998 = vmatmul.mubr.f32.gmra.mrb[42].mxu1 %v1335_v23 }
 0x1b2   :  { %1000 = vmatprep.mubr.f32.mxu1 %v1337_v27 }
 0x1b5   :  { %1001 = vmatmul.mubr.f32.gmra.mrb[44].mxu1 %v1339_v31 }
 0x1b6   :  { %1003 = vmatprep.mubr.f32.mxu1 %v439_v35 }
 0x1b9   :  { %1004 = vmatmul.mubr.f32.gmra.mrb[46].mxu1 %v444_v39 }
 0x224   :  { %v960_v10 = vpop.f32.mrb[16].mxu1 }
 0x225   :  { %v642_v11 = vadd.f32 %v960_v10, %v1350_v9  ;;  %v636_v12 = vpop.f32.mrb[17].mxu1 }
 0x226   :  { %v637_v13 = vadd.f32 %v1350_v9, %v636_v12 }
 0x227   :  { %v796_v14 = vmax.f32 %v642_v11, 0.0 }
 0x228   :  { %v795_v15 = vmax.f32 %v637_v13, 0.0 }
 0x229   :  { %828 = vst [vmem:[#allocation9 + $0x8] sm:$0xff] %v796_v14 }
 0x22a   :  { %827 = vst [vmem:[#allocation9] sm:$0xff] %v795_v15 }
 0x22c   :  { %v963_v16 = vpop.f32.mrb[18].mxu1 }
 0x22d   :  { %v652_v17 = vadd.f32 %v963_v16, %v1350_v9  ;;  %v646_v18 = vpop.f32.mrb[19].mxu1 }
 0x22e   :  { %v647_v19 = vadd.f32 %v1350_v9, %v646_v18 }
 0x22f   :  { %v798_v20 = vmax.f32 %v652_v17, 0.0 }
 0x230   :  { %v797_v21 = vmax.f32 %v647_v19, 0.0 }
 0x231   :  { %830 = vst [vmem:[#allocation9 + $0x18] sm:$0xff] %v798_v20 }
 0x232   :  { %829 = vst [vmem:[#allocation9 + $0x10] sm:$0xff] %v797_v21 }
 0x234   :  { %v966_v22 = vpop.f32.mrb[20].mxu1 }
 0x235   :  { %v662_v23 = vadd.f32 %v966_v22, %v1350_v9  ;;  %v656_v24 = vpop.f32.mrb[21].mxu1 }
 0x236   :  { %v657_v25 = vadd.f32 %v1350_v9, %v656_v24 }
 0x237   :  { %v800_v26 = vmax.f32 %v662_v23, 0.0 }
 0x238   :  { %v799_v27 = vmax.f32 %v657_v25, 0.0 }
 0x239   :  { %832 = vst [vmem:[#allocation9 + $0x28] sm:$0xff] %v800_v26 }
 0x23a   :  { %831 = vst [vmem:[#allocation9 + $0x20] sm:$0xff] %v799_v27 }
 0x23c   :  { %v969_v28 = vpop.f32.mrb[22].mxu1 }
 0x23d   :  { %v672_v29 = vadd.f32 %v969_v28, %v1350_v9  ;;  %v666_v30 = vpop.f32.mrb[23].mxu1 }
 0x23e   :  { %v667_v31 = vadd.f32 %v1350_v9, %v666_v30 }
 0x23f   :  { %v802_v32 = vmax.f32 %v672_v29, 0.0 }
 0x240   :  { %v801_v33 = vmax.f32 %v667_v31, 0.0 }
 0x241   :  { %834 = vst [vmem:[#allocation9 + $0x38] sm:$0xff] %v802_v32 }
 0x242   :  { %833 = vst [vmem:[#allocation9 + $0x30] sm:$0xff] %v801_v33 }
 0x244   :  { %v972_v34 = vpop.f32.mrb[24].mxu1 }
 0x245   :  { %v682_v35 = vadd.f32 %v972_v34, %v1350_v9  ;;  %v676_v36 = vpop.f32.mrb[25].mxu1 }
 0x246   :  { %v677_v37 = vadd.f32 %v1350_v9, %v676_v36 }
 0x247   :  { %v804_v38 = vmax.f32 %v682_v35, 0.0 }
 0x248   :  { %v803_v39 = vmax.f32 %v677_v37, 0.0 }
 0x249   :  { %836 = vst [vmem:[#allocation9 + $0x48] sm:$0xff] %v804_v38 }
 0x24a   :  { %835 = vst [vmem:[#allocation9 + $0x40] sm:$0xff] %v803_v39 }
 0x24c   :  { %v975_v40 = vpop.f32.mrb[26].mxu1 }
 0x24d   :  { %v692_v41 = vadd.f32 %v975_v40, %v1350_v9  ;;  %v686_v42 = vpop.f32.mrb[27].mxu1 }
 0x24e   :  { %v687_v43 = vadd.f32 %v1350_v9, %v686_v42 }
 0x24f   :  { %v806_v44 = vmax.f32 %v692_v41, 0.0 }
 0x250   :  { %v805_v45 = vmax.f32 %v687_v43, 0.0 }
 0x251   :  { %838 = vst [vmem:[#allocation9 + $0x58] sm:$0xff] %v806_v44 }
 0x252   :  { %837 = vst [vmem:[#allocation9 + $0x50] sm:$0xff] %v805_v45 }
 0x254   :  { %v978_v46 = vpop.f32.mrb[28].mxu1 }
 0x255   :  { %v702_v47 = vadd.f32 %v978_v46, %v1350_v9  ;;  %v696_v48 = vpop.f32.mrb[29].mxu1 }
 0x256   :  { %v697_v49 = vadd.f32 %v1350_v9, %v696_v48 }
 0x257   :  { %v808_v50 = vmax.f32 %v702_v47, 0.0 }
 0x258   :  { %v807_v51 = vmax.f32 %v697_v49, 0.0 }
 0x259   :  { %840 = vst [vmem:[#allocation9 + $0x68] sm:$0xff] %v808_v50 }
 0x25a   :  { %839 = vst [vmem:[#allocation9 + $0x60] sm:$0xff] %v807_v51 }
 0x25c   :  { %v981_v52 = vpop.f32.mrb[30].mxu1 }
 0x25d   :  { %v712_v53 = vadd.f32 %v981_v52, %v1350_v9  ;;  %v706_v54 = vpop.f32.mrb[31].mxu1 }
 0x25e   :  { %v707_v55 = vadd.f32 %v1350_v9, %v706_v54 }
 0x25f   :  { %v810_v56 = vmax.f32 %v712_v53, 0.0 }
 0x260   :  { %v809_v57 = vmax.f32 %v707_v55, 0.0 }
 0x261   :  { %842 = vst [vmem:[#allocation9 + $0x78] sm:$0xff] %v810_v56 }
 0x262   :  { %841 = vst [vmem:[#allocation9 + $0x70] sm:$0xff] %v809_v57 }
 0x264   :  { %v984_v58 = vpop.f32.mrb[32].mxu1 }
 0x265   :  { %v722_v59 = vadd.f32 %v984_v58, %v1350_v9  ;;  %v716_v60 = vpop.f32.mrb[33].mxu1 }
 0x266   :  { %v717_v61 = vadd.f32 %v1350_v9, %v716_v60 }
 0x267   :  { %v812_v62 = vmax.f32 %v722_v59, 0.0 }
 0x268   :  { %v811_v63 = vmax.f32 %v717_v61, 0.0 }
 0x269   :  { %844 = vst [vmem:[#allocation9 + $0x88] sm:$0xff] %v812_v62 }
 0x26a   :  { %843 = vst [vmem:[#allocation9 + $0x80] sm:$0xff] %v811_v63 }
 0x26c   :  { %v987_v1 = vpop.f32.mrb[34].mxu1 }
 0x26d   :  { %v732_v0 = vadd.f32 %v987_v1, %v1350_v9  ;;  %v726_v2 = vpop.f32.mrb[35].mxu1 }
 0x26e   :  { %v727_v3 = vadd.f32 %v1350_v9, %v726_v2 }
 0x26f   :  { %v814_v4 = vmax.f32 %v732_v0, 0.0 }
 0x270   :  { %v813_v5 = vmax.f32 %v727_v3, 0.0 }
 0x271   :  { %846 = vst [vmem:[#allocation9 + $0x98] sm:$0xff] %v814_v4 }
 0x272   :  { %845 = vst [vmem:[#allocation9 + $0x90] sm:$0xff] %v813_v5 }
 0x274   :  { %v990_v6 = vpop.f32.mrb[36].mxu1 }
 0x275   :  { %v742_v7 = vadd.f32 %v990_v6, %v1350_v9  ;;  %v736_v8 = vpop.f32.mrb[37].mxu1 }
 0x276   :  { %v737_v10 = vadd.f32 %v1350_v9, %v736_v8 }
 0x277   :  { %v816_v11 = vmax.f32 %v742_v7, 0.0 }
 0x278   :  { %v815_v12 = vmax.f32 %v737_v10, 0.0 }
 0x279   :  { %848 = vst [vmem:[#allocation9 + $0xa8] sm:$0xff] %v816_v11 }
 0x27a   :  { %847 = vst [vmem:[#allocation9 + $0xa0] sm:$0xff] %v815_v12 }
 0x27c   :  { %v993_v13 = vpop.f32.mrb[38].mxu1 }
 0x27d   :  { %v752_v14 = vadd.f32 %v993_v13, %v1350_v9  ;;  %v746_v15 = vpop.f32.mrb[39].mxu1 }
 0x27e   :  { %v747_v16 = vadd.f32 %v1350_v9, %v746_v15 }
 0x27f   :  { %v818_v17 = vmax.f32 %v752_v14, 0.0 }
 0x280   :  { %v817_v18 = vmax.f32 %v747_v16, 0.0  ;;  %v996_v19 = vpop.f32.mrb[40].mxu1 }
 0x281   :  { %850 = vst [vmem:[#allocation9 + $0xb8] sm:$0xff] %v818_v17  ;;  %v762_v20 = vadd.f32 %v996_v19, %v1350_v9  ;;  %v756_v21 = vpop.f32.mrb[41].mxu1 }
 0x282   :  { %849 = vst [vmem:[#allocation9 + $0xb0] sm:$0xff] %v817_v18  ;;  %v757_v22 = vadd.f32 %v1350_v9, %v756_v21 }
 0x283   :  { %v820_v23 = vmax.f32 %v762_v20, 0.0 }
 0x284   :  { %v819_v24 = vmax.f32 %v757_v22, 0.0  ;;  %v999_v25 = vpop.f32.mrb[42].mxu1 }
 0x285   :  { %852 = vst [vmem:[#allocation9 + $0xc8] sm:$0xff] %v820_v23  ;;  %v772_v26 = vadd.f32 %v999_v25, %v1350_v9  ;;  %v766_v27 = vpop.f32.mrb[43].mxu1 }
 0x286   :  { %851 = vst [vmem:[#allocation9 + $0xc0] sm:$0xff] %v819_v24  ;;  %v767_v28 = vadd.f32 %v1350_v9, %v766_v27 }
 0x287   :  { %v822_v29 = vmax.f32 %v772_v26, 0.0 }
 0x288   :  { %v821_v30 = vmax.f32 %v767_v28, 0.0  ;;  %v1002_v31 = vpop.f32.mrb[44].mxu1 }
 0x289   :  { %854 = vst [vmem:[#allocation9 + $0xd8] sm:$0xff] %v822_v29  ;;  %v782_v32 = vadd.f32 %v1002_v31, %v1350_v9  ;;  %v776_v33 = vpop.f32.mrb[45].mxu1 }
 0x28a   :  { %853 = vst [vmem:[#allocation9 + $0xd0] sm:$0xff] %v821_v30  ;;  %v777_v34 = vadd.f32 %v1350_v9, %v776_v33 }
 0x28b   :  { %v824_v35 = vmax.f32 %v782_v32, 0.0 }
 0x28c   :  { %v823_v36 = vmax.f32 %v777_v34, 0.0  ;;  %v1005_v37 = vpop.f32.mrb[46].mxu1 }
 0x28d   :  { %856 = vst [vmem:[#allocation9 + $0xe8] sm:$0xff] %v824_v35  ;;  %v792_v38 = vadd.f32 %v1005_v37, %v1350_v9  ;;  %v786_v39 = vpop.f32.mrb[47].mxu1 }
 0x28e   :  { %855 = vst [vmem:[#allocation9 + $0xe0] sm:$0xff] %v823_v36  ;;  %v787_v40 = vadd.f32 %v1350_v9, %v786_v39 }
 0x28f   :  { %v826_v41 = vmax.f32 %v792_v38, 0.0 }
 0x290   :  { %v825_v42 = vmax.f32 %v787_v40, 0.0 }
 0x291   :  { %858 = vst [vmem:[#allocation9 + $0xf8] sm:$0xff] %v826_v41 }
 0x292   :  { %857 = vst [vmem:[#allocation9 + $0xf0] sm:$0xff] %v825_v42 }
 0x293   :  { %1204 = shalt.err (!%p1201_p0)
}
 0x294   :  { %s1205_s8 = scalar_lea.hbm %s1403_s4, 4096 }
 0x295   :  { %p1206_p1 = scmp.ne.s32.totalorder %s1403_s4, %s1205_s8  ;;  %p1209_p2 = scmp.lt.u32.totalorder %s1205_s8, %s1403_s4 }
 0x297   :  { %p1211_p3 = pnand %p1209_p2, %p1206_p1 }
 0x299   :  { %1214 = shalt.err (!%p1211_p3)
}
 0x29a   :  { %870 = dma.vmem_to_hbm [thread:$0]  %s865_s30, 4096, %s1403_s4, [#allocation5], %s1222_s25, %s1222_s25, %s1223_s26  }
 0x29b   :  { %1219 = dma.done.wait [#allocation5], 4096  }
 0x29c   :  { %1220 = vsyncadd [#allocation5], 4294963200 }
 0x29d   :  { %874 = vsyncpa [#allocation4], 1 }
 0x29e   :  { %875 = vsyncpa [#allocation7], 1 }
 0x29f   :  { %876 = vsyncpa [#allocation5], 1 }

</bundles_post_ra>
